<compile_context>
chip_gen: v7x
topology: tpu7x:2x2x1
jax: 0.10.0
libtpu: 0.0.40
codegen_flags: <defaults>
</compile_context>

<pallas_src>
import functools

import jax
import jax.numpy as jnp
from jax.experimental import pallas as pl
from jax.experimental.pallas import tpu as pltpu

LANE = 128
SUBLANE = 8


def _round_up(n, m):
    return ((n + m - 1) // m) * m


def _make_block_kernel(units):
    def kernel(x_ref, w1_ref, b1_ref, w2_ref, b2_ref,
               w3_ref, b3_ref, w4_ref, b4_ref, o_ref):
        # fc1 + ReLU  (bf16 MXU operands, f32 accumulation; epilogue in f32)
        x = x_ref[...].astype(jnp.bfloat16)
        h = jnp.dot(x, w1_ref[...], preferred_element_type=jnp.float32)
        h = jnp.maximum(h + b1_ref[...], 0.0)
        # fc2 + ReLU
        h = jnp.dot(h.astype(jnp.bfloat16), w2_ref[...],
                    preferred_element_type=jnp.float32)
        h = jnp.maximum(h + b2_ref[...], 0.0)
        # fc3 + ReLU
        h = jnp.dot(h.astype(jnp.bfloat16), w3_ref[...],
                    preferred_element_type=jnp.float32)
        h = jnp.maximum(h + b3_ref[...], 0.0)
        # fc4 + ReLU
        h = jnp.dot(h.astype(jnp.bfloat16), w4_ref[...],
                    preferred_element_type=jnp.float32)
        h = jnp.maximum(h + b4_ref[...], 0.0)
        # Store only the real `units` columns (padded lanes dropped here, not by a
        # separate XLA slice kernel afterwards).
        o_ref[...] = h[:, :units].astype(o_ref.dtype)
        # TODO(synk): training-mode dropout (stochastic masking via pltpu.prng_*) is not
        # implemented; this forward matches the PyTorch module in eval() mode.
    return kernel


def prepare_params(params, *, weight_dtype=jnp.bfloat16):
    """One-time prep (hoisted off the forward path): pad every `units` dim up to a lane
    multiple (128) and cast weights to bf16 for the MXU; biases stay f32.  The fc1 input
    dim (backcast_length) is deliberately left unpadded."""
    backcast_length, units = params["w1"].shape
    up = _round_up(units, LANE)

    def pad_to(a, rows, cols, dtype):
        buf = jnp.zeros((rows, cols), dtype)
        return buf.at[: a.shape[0], : a.shape[1]].set(a.astype(dtype))

    return {
        "w1": pad_to(params["w1"], backcast_length, up, weight_dtype),
        "w2": pad_to(params["w2"], up, up, weight_dtype),
        "w3": pad_to(params["w3"], up, up, weight_dtype),
        "w4": pad_to(params["w4"], up, up, weight_dtype),
        "b1": pad_to(params["b1"], 1, up, jnp.float32),
        "b2": pad_to(params["b2"], 1, up, jnp.float32),
        "b3": pad_to(params["b3"], 1, up, jnp.float32),
        "b4": pad_to(params["b4"], 1, up, jnp.float32),
    }


def _pick_batch_tile(batch, max_tile):
    if batch <= max_tile:
        return batch                       # single grid step; full-dim block is legal
    n_steps = pl.cdiv(batch, max_tile)
    if n_steps % 2:                        # even step counts balance v7x's 2 TensorCores
        n_steps += 1
    return _round_up(pl.cdiv(batch, n_steps), SUBLANE)


@functools.partial(jax.jit, static_argnames=("units", "max_batch_tile"))
def block_forward(x, prepped, *, units, max_batch_tile=512):
    """x: (B, backcast_length) f32; prepped: output of prepare_params(). -> (B, units) f32."""
    B, L = x.shape
    up = prepped["w2"].shape[1]
    TB = _pick_batch_tile(B, max_batch_tile)
    grid = (pl.cdiv(B, TB),)

    # Weights/biases stay VMEM-resident across all batch steps (constant block index).
    resident = lambda a: pl.BlockSpec(a.shape, lambda i: (0, 0))

    # Conservative VMEM budget: double-buffered x/out tiles + weights/biases (counted
    # double-buffered) + f32 intermediates; never below the usual 32 MiB default.
    vmem_bytes = (2 * TB * L * 4 + 2 * TB * units * 4
                  + 2 * 2 * (L * up + 3 * up * up)
                  + 2 * 4 * up * 4
                  + 2 * TB * up * 4)
    vmem_limit = int(min(max(2 * vmem_bytes, 32 * 1024 * 1024), 64 * 1024 * 1024))

    return pl.pallas_call(
        _make_block_kernel(units),
        out_shape=jax.ShapeDtypeStruct((B, units), jnp.float32),
        grid=grid,
        in_specs=[
            pl.BlockSpec((TB, L), lambda i: (i, 0)),   # x: tiled over batch (ragged last block OK)
            resident(prepped["w1"]), resident(prepped["b1"]),
            resident(prepped["w2"]), resident(prepped["b2"]),
            resident(prepped["w3"]), resident(prepped["b3"]),
            resident(prepped["w4"]), resident(prepped["b4"]),
        ],
        out_specs=pl.BlockSpec((TB, units), lambda i: (i, 0)),
        compiler_params=pltpu.CompilerParams(
            dimension_semantics=("parallel",),
            vmem_limit_bytes=vmem_limit),
    )(x, prepped["w1"], prepped["b1"], prepped["w2"], prepped["b2"],
      prepped["w3"], prepped["b3"], prepped["w4"], prepped["b4"])


def init_params(key, backcast_length, units):
    """nn.Linear-style U(-1/sqrt(fan_in), 1/sqrt(fan_in)); weights stored (in, out)."""
    keys = jax.random.split(key, 8)

    def linear(kw, kb, fan_in, fan_out):
        bound = 1.0 / jnp.sqrt(fan_in)
        w = jax.random.uniform(kw, (fan_in, fan_out), jnp.float32, -bound, bound)
        b = jax.random.uniform(kb, (1, fan_out), jnp.float32, -bound, bound)
        return w, b

    w1, b1 = linear(keys[0], keys[1], backcast_length, units)
    w2, b2 = linear(keys[2], keys[3], units, units)
    w3, b3 = linear(keys[4], keys[5], units, units)
    w4, b4 = linear(keys[6], keys[7], units, units)
    return dict(w1=w1, b1=b1, w2=w2, b2=b2, w3=w3, b3=b3, w4=w4, b4=b4)


def reference_forward_bf16(x, p):
    """Pure-JAX reference emulating the kernel's bf16-input / f32-accumulate numerics."""
    def layer(h, w, b):
        y = jnp.dot(h.astype(jnp.bfloat16), w.astype(jnp.bfloat16),
                    preferred_element_type=jnp.float32) + b
        return jnp.maximum(y, 0.0)
    h = layer(x, p["w1"], p["b1"])
    h = layer(h, p["w2"], p["b2"])
    h = layer(h, p["w3"], p["b3"])
    h = layer(h, p["w4"], p["b4"])
    return h


if __name__ == "__main__":
    backcast_length = 10
    units = 32
    batch = 8

    key = jax.random.PRNGKey(0)
    kx, kp, kx2 = jax.random.split(key, 3)
    x = jax.random.normal(kx, (batch, backcast_length), jnp.float32)
    params = init_params(kp, backcast_length, units)

    # One-time weight prep (padding + bf16 cast) — hoisted off the forward path.
    prepped = prepare_params(params)

    out = jax.block_until_ready(block_forward(x, prepped, units=units))
    ref = reference_forward_bf16(x, params)
    assert out.shape == (batch, units)
    assert jnp.allclose(out, ref, atol=5e-3, rtol=5e-3), "mismatch vs reference (small)"

    # Larger, non-multiple batch exercises the ragged batch grid (2 tiles of 280 rows).
    big_batch = 552
    x_big = jax.random.normal(kx2, (big_batch, backcast_length), jnp.float32)
    out_big = jax.block_until_ready(block_forward(x_big, prepped, units=units))
    ref_big = reference_forward_bf16(x_big, params)
    assert out_big.shape == (big_batch, units)
    assert jnp.allclose(out_big, ref_big, atol=5e-3, rtol=5e-3), "mismatch vs reference (big)"

    print("KERNEL_OK")
</pallas_src>

<mosaic_0001>
module attributes {stable_mosaic.version = 11 : i64} {
  func.func @kernel(%arg0: i32, %arg1: memref<8x10xf32, #tpu.memory_space<vmem>>, %arg2: memref<10x128xbf16, #tpu.memory_space<vmem>>, %arg3: memref<1x128xf32, #tpu.memory_space<vmem>>, %arg4: memref<128x128xbf16, #tpu.memory_space<vmem>>, %arg5: memref<1x128xf32, #tpu.memory_space<vmem>>, %arg6: memref<128x128xbf16, #tpu.memory_space<vmem>>, %arg7: memref<1x128xf32, #tpu.memory_space<vmem>>, %arg8: memref<128x128xbf16, #tpu.memory_space<vmem>>, %arg9: memref<1x128xf32, #tpu.memory_space<vmem>>, %arg10: memref<8x32xf32, #tpu.memory_space<vmem>>) attributes {dimension_semantics = [#tpu.dimension_semantics<parallel>], iteration_bounds = array<i64: 1>, scalar_prefetch = 0 : i64, scratch_operands = 0 : i64, tpu.core_type = #tpu.core_type<tc>, window_params = [{transform_indices = @transform_0, window_bounds = array<i64: 8, 10>}, {pipeline_mode = #tpu.pipeline_mode<synchronous>, transform_indices = @transform_1, window_bounds = array<i64: 10, 128>}, {pipeline_mode = #tpu.pipeline_mode<synchronous>, transform_indices = @transform_2, window_bounds = array<i64: 1, 128>}, {pipeline_mode = #tpu.pipeline_mode<synchronous>, transform_indices = @transform_3, window_bounds = array<i64: 128, 128>}, {pipeline_mode = #tpu.pipeline_mode<synchronous>, transform_indices = @transform_4, window_bounds = array<i64: 1, 128>}, {pipeline_mode = #tpu.pipeline_mode<synchronous>, transform_indices = @transform_5, window_bounds = array<i64: 128, 128>}, {pipeline_mode = #tpu.pipeline_mode<synchronous>, transform_indices = @transform_6, window_bounds = array<i64: 1, 128>}, {pipeline_mode = #tpu.pipeline_mode<synchronous>, transform_indices = @transform_7, window_bounds = array<i64: 128, 128>}, {pipeline_mode = #tpu.pipeline_mode<synchronous>, transform_indices = @transform_8, window_bounds = array<i64: 1, 128>}, {transform_indices = @transform_9, window_bounds = array<i64: 8, 32>}]} {
    %c0 = arith.constant 0 : index
    %c0_0 = arith.constant 0 : index
    %0 = vector.load %arg1[%c0, %c0_0] : memref<8x10xf32, #tpu.memory_space<vmem>>, vector<8x10xf32>
    %1 = arith.truncf %0 : vector<8x10xf32> to vector<8x10xbf16>
    %c0_1 = arith.constant 0 : index
    %c0_2 = arith.constant 0 : index
    %2 = vector.load %arg2[%c0_1, %c0_2] : memref<10x128xbf16, #tpu.memory_space<vmem>>, vector<10x128xbf16>
    %cst = arith.constant dense<0.000000e+00> : vector<8x128xf32>
    %3 = tpu.matmul %1, %2, %cst {dimension_numbers = #tpu.dot_dimension_numbers<[1], [0], [0], [1], [0, 0, 1, 1], [], []>} : vector<8x10xbf16>, vector<10x128xbf16>, vector<8x128xf32> -> vector<8x128xf32>
    %c0_3 = arith.constant 0 : index
    %c0_4 = arith.constant 0 : index
    %4 = vector.load %arg3[%c0_3, %c0_4] : memref<1x128xf32, #tpu.memory_space<vmem>>, vector<1x128xf32>
    %5 = vector.broadcast %4 : vector<1x128xf32> to vector<8x128xf32>
    %6 = arith.addf %3, %5 : vector<8x128xf32>
    %cst_5 = arith.constant 0.000000e+00 : f32
    %7 = vector.broadcast %cst_5 : f32 to vector<8x128xf32>
    %8 = arith.maximumf %6, %7 : vector<8x128xf32>
    %9 = arith.truncf %8 : vector<8x128xf32> to vector<8x128xbf16>
    %c0_6 = arith.constant 0 : index
    %c0_7 = arith.constant 0 : index
    %10 = vector.load %arg4[%c0_6, %c0_7] : memref<128x128xbf16, #tpu.memory_space<vmem>>, vector<128x128xbf16>
    %cst_8 = arith.constant dense<0.000000e+00> : vector<8x128xf32>
    %11 = tpu.matmul %9, %10, %cst_8 {dimension_numbers = #tpu.dot_dimension_numbers<[1], [0], [0], [1], [0, 0, 1, 1], [], []>} : vector<8x128xbf16>, vector<128x128xbf16>, vector<8x128xf32> -> vector<8x128xf32>
    %c0_9 = arith.constant 0 : index
    %c0_10 = arith.constant 0 : index
    %12 = vector.load %arg5[%c0_9, %c0_10] : memref<1x128xf32, #tpu.memory_space<vmem>>, vector<1x128xf32>
    %13 = vector.broadcast %12 : vector<1x128xf32> to vector<8x128xf32>
    %14 = arith.addf %11, %13 : vector<8x128xf32>
    %cst_11 = arith.constant 0.000000e+00 : f32
    %15 = vector.broadcast %cst_11 : f32 to vector<8x128xf32>
    %16 = arith.maximumf %14, %15 : vector<8x128xf32>
    %17 = arith.truncf %16 : vector<8x128xf32> to vector<8x128xbf16>
    %c0_12 = arith.constant 0 : index
    %c0_13 = arith.constant 0 : index
    %18 = vector.load %arg6[%c0_12, %c0_13] : memref<128x128xbf16, #tpu.memory_space<vmem>>, vector<128x128xbf16>
    %cst_14 = arith.constant dense<0.000000e+00> : vector<8x128xf32>
    %19 = tpu.matmul %17, %18, %cst_14 {dimension_numbers = #tpu.dot_dimension_numbers<[1], [0], [0], [1], [0, 0, 1, 1], [], []>} : vector<8x128xbf16>, vector<128x128xbf16>, vector<8x128xf32> -> vector<8x128xf32>
    %c0_15 = arith.constant 0 : index
    %c0_16 = arith.constant 0 : index
    %20 = vector.load %arg7[%c0_15, %c0_16] : memref<1x128xf32, #tpu.memory_space<vmem>>, vector<1x128xf32>
    %21 = vector.broadcast %20 : vector<1x128xf32> to vector<8x128xf32>
    %22 = arith.addf %19, %21 : vector<8x128xf32>
    %cst_17 = arith.constant 0.000000e+00 : f32
    %23 = vector.broadcast %cst_17 : f32 to vector<8x128xf32>
    %24 = arith.maximumf %22, %23 : vector<8x128xf32>
    %25 = arith.truncf %24 : vector<8x128xf32> to vector<8x128xbf16>
    %c0_18 = arith.constant 0 : index
    %c0_19 = arith.constant 0 : index
    %26 = vector.load %arg8[%c0_18, %c0_19] : memref<128x128xbf16, #tpu.memory_space<vmem>>, vector<128x128xbf16>
    %cst_20 = arith.constant dense<0.000000e+00> : vector<8x128xf32>
    %27 = tpu.matmul %25, %26, %cst_20 {dimension_numbers = #tpu.dot_dimension_numbers<[1], [0], [0], [1], [0, 0, 1, 1], [], []>} : vector<8x128xbf16>, vector<128x128xbf16>, vector<8x128xf32> -> vector<8x128xf32>
    %c0_21 = arith.constant 0 : index
    %c0_22 = arith.constant 0 : index
    %28 = vector.load %arg9[%c0_21, %c0_22] : memref<1x128xf32, #tpu.memory_space<vmem>>, vector<1x128xf32>
    %29 = vector.broadcast %28 : vector<1x128xf32> to vector<8x128xf32>
    %30 = arith.addf %27, %29 : vector<8x128xf32>
    %cst_23 = arith.constant 0.000000e+00 : f32
    %31 = vector.broadcast %cst_23 : f32 to vector<8x128xf32>
    %32 = arith.maximumf %30, %31 : vector<8x128xf32>
    %33 = vector.extract_strided_slice %32 {offsets = [0, 0], sizes = [8, 32], strides = [1, 1]} : vector<8x128xf32> to vector<8x32xf32>
    %c0_24 = arith.constant 0 : index
    %c0_25 = arith.constant 0 : index
    %34 = vector.load %arg10[%c0_24, %c0_25] : memref<8x32xf32, #tpu.memory_space<vmem>>, vector<8x32xf32>
    tpu.vector_store %arg10[%c0_24, %c0_25], %33 {strides = array<i32>} : memref<8x32xf32, #tpu.memory_space<vmem>>, vector<8x32xf32>,
    return
  }
  func.func @transform_0(%arg0: i32) -> (i32, i32) {
    %c0_i32 = arith.constant 0 : i32
    %c0_i32_0 = arith.constant 0 : i32
    return %arg0, %c0_i32 : i32, i32
  }
  func.func @transform_1(%arg0: i32) -> (i32, i32) {
    %c0_i32 = arith.constant 0 : i32
    %c0_i32_0 = arith.constant 0 : i32
    %c0_i32_1 = arith.constant 0 : i32
    return %c0_i32, %c0_i32_0 : i32, i32
  }
  func.func @transform_2(%arg0: i32) -> (i32, i32) {
    %c0_i32 = arith.constant 0 : i32
    %c0_i32_0 = arith.constant 0 : i32
    %c0_i32_1 = arith.constant 0 : i32
    return %c0_i32, %c0_i32_0 : i32, i32
  }
  func.func @transform_3(%arg0: i32) -> (i32, i32) {
    %c0_i32 = arith.constant 0 : i32
    %c0_i32_0 = arith.constant 0 : i32
    %c0_i32_1 = arith.constant 0 : i32
    return %c0_i32, %c0_i32_0 : i32, i32
  }
  func.func @transform_4(%arg0: i32) -> (i32, i32) {
    %c0_i32 = arith.constant 0 : i32
    %c0_i32_0 = arith.constant 0 : i32
    %c0_i32_1 = arith.constant 0 : i32
    return %c0_i32, %c0_i32_0 : i32, i32
  }
  func.func @transform_5(%arg0: i32) -> (i32, i32) {
    %c0_i32 = arith.constant 0 : i32
    %c0_i32_0 = arith.constant 0 : i32
    %c0_i32_1 = arith.constant 0 : i32
    return %c0_i32, %c0_i32_0 : i32, i32
  }
  func.func @transform_6(%arg0: i32) -> (i32, i32) {
    %c0_i32 = arith.constant 0 : i32
    %c0_i32_0 = arith.constant 0 : i32
    %c0_i32_1 = arith.constant 0 : i32
    return %c0_i32, %c0_i32_0 : i32, i32
  }
  func.func @transform_7(%arg0: i32) -> (i32, i32) {
    %c0_i32 = arith.constant 0 : i32
    %c0_i32_0 = arith.constant 0 : i32
    %c0_i32_1 = arith.constant 0 : i32
    return %c0_i32, %c0_i32_0 : i32, i32
  }
  func.func @transform_8(%arg0: i32) -> (i32, i32) {
    %c0_i32 = arith.constant 0 : i32
    %c0_i32_0 = arith.constant 0 : i32
    %c0_i32_1 = arith.constant 0 : i32
    return %c0_i32, %c0_i32_0 : i32, i32
  }
  func.func @transform_9(%arg0: i32) -> (i32, i32) {
    %c0_i32 = arith.constant 0 : i32
    %c0_i32_0 = arith.constant 0 : i32
    return %arg0, %c0_i32 : i32, i32
  }
}

</mosaic_0001>

<bundles_post_ra>
// kernel: block_forward.1
= control target key start
LH: loop header
LB: loop body
LE: loop exit
PB: predicated region body
PF: predicated region fallthrough
CT: control target
= control target key end

     0   :  { %14 = vsyncpa [#allocation3], 0  ;;  %s963_s0 = inlined_call_operand.hbm [shape: f32[8,10], index: 0, kind: input, shape index: {}]   ;;  %s964_s1 = inlined_call_operand.vmem [shape: bf16[10,128], index: 1, kind: input, shape index: {}]   ;;  %s965_s2 = inlined_call_operand.vmem [shape: f32[1,128], index: 2, kind: input, shape index: {}]   ;;  %s966_s3 = inlined_call_operand.hbm [shape: bf16[128,128], index: 3, kind: input, shape index: {}]   ;;  %s967_s4 = inlined_call_operand.vmem [shape: f32[1,128], index: 4, kind: input, shape index: {}]   ;;  %s968_s5 = inlined_call_operand.hbm [shape: bf16[128,128], index: 5, kind: input, shape index: {}]   ;;  %s969_s6 = inlined_call_operand.vmem [shape: f32[1,128], index: 6, kind: input, shape index: {}]   ;;  %s970_s7 = inlined_call_operand.hbm [shape: bf16[128,128], index: 7, kind: input, shape index: {}]   ;;  %s971_s8 = inlined_call_operand.vmem [shape: f32[1,128], index: 8, kind: input, shape index: {}]   ;;  %s972_s9 = inlined_call_operand.hbm [shape: f32[8,32], index: 9, kind: output, shape index: {}]  }
   0x1   :  { %15 = vsyncpa [#allocation6], 0 }
   0x2   :  { %16 = vsyncpa [#allocation9], 0 }
   0x3   :  { %17 = vsyncpa [#allocation4], 0  ;;  %s787_s30 = smov [#allocation5]   ;;  %s669_s13 = scalar_lea.hbm %s966_s3, 1024 }
   0x4   :  { %s37_s10 = sshll.u32 %s787_s30, 4  ;;  %p670_p0 = scmp.ne.s32.totalorder %s966_s3, %s669_s13  ;;  %s38_s10 = int_to_ptr.vmem [resolvable:$true] %s37_s10 }
   0x5   :  { %p673_p1 = scmp.lt.u32.totalorder %s669_s13, %s966_s3 }
   0x7   :  { %p675_p2 = pnand %p673_p1, %p670_p0 }
   0x9   :  { %678 = shalt.err (!%p675_p2)
}
   0xa   :  { %s679_s18 = scalar_lea.vmem %s38_s10, 1024  ;;  %p684_p4 = scmp.lt.s32.totalorder %s38_s10, %s38_s10 }
   0xb   :  { %p680_p3 = scmp.ne.s32.totalorder %s38_s10, %s679_s18  ;;  %p685_p5 = scmp.lt.s32.totalorder %s679_s18, %s679_s18 }
   0xd   :  { %p686_p6 = por %p685_p5, %p684_p4 }
   0xf   :  { %p687_p7 = pnand %p686_p6, %p680_p3 }
  0x11   :  { %690 = shalt.err (!%p687_p7)
}
  0x12   :  { %s788_s19 = smov 64   ;;  %s789_s20 = smov 4  }
  0x13   :  { %43 = dma.hbm_to_vmem [thread:$0]  %s966_s3, 1024, %s38_s10, [#allocation6], %s788_s19, %s788_s19, %s789_s20  }
  0x14   :  { %s790_s23 = smov [#allocation2]   ;;  %s791_s25 = smov [#allocation7]  }
  0x15   :  { %s24_s24 = sshll.u32 %s790_s23, 4  ;;  %s51_s26 = sshll.u32 %s791_s25, 4  ;;  %s25_s24 = int_to_ptr.vmem [resolvable:$true] %s24_s24  ;;  %s52_s26 = int_to_ptr.vmem [resolvable:$true] %s51_s26 }
  0x16   :  { %s691_s29 = scalar_lea.hbm %s963_s0, 128 }
  0x17   :  { %p692_p8 = scmp.ne.s32.totalorder %s963_s0, %s691_s29  ;;  %p695_p9 = scmp.lt.u32.totalorder %s691_s29, %s963_s0 }
  0x19   :  { %p697_p10 = pnand %p695_p9, %p692_p8 }
  0x1b   :  { %700 = shalt.err (!%p697_p10)
}
  0x1c   :  { %s701_s3 = scalar_lea.vmem %s25_s24, 128  ;;  %p706_p12 = scmp.lt.s32.totalorder %s25_s24, %s25_s24 }
  0x1d   :  { %p702_p11 = scmp.ne.s32.totalorder %s25_s24, %s701_s3  ;;  %p707_p13 = scmp.lt.s32.totalorder %s701_s3, %s701_s3 }
  0x1f   :  { %p708_p0 = por %p707_p13, %p706_p12 }
  0x21   :  { %p709_p1 = pnand %p708_p0, %p702_p11 }
  0x23   :  { %712 = shalt.err (!%p709_p1)
}
  0x24   :  { %27 = dma.hbm_to_vmem [thread:$0]  %s963_s0, 128, %s25_s24, [#allocation3]  }
  0x25   :  { %s713_s17 = scalar_lea.hbm %s968_s5, 1024 }
  0x26   :  { %p714_p2 = scmp.ne.s32.totalorder %s968_s5, %s713_s17  ;;  %p717_p3 = scmp.lt.u32.totalorder %s713_s17, %s968_s5 }
  0x28   :  { %p719_p4 = pnand %p717_p3, %p714_p2 }
  0x2a   :  { %722 = shalt.err (!%p719_p4)
}
  0x2b   :  { %s723_s25 = scalar_lea.vmem %s52_s26, 1024  ;;  %p728_p6 = scmp.lt.s32.totalorder %s52_s26, %s52_s26 }
  0x2c   :  { %p724_p5 = scmp.ne.s32.totalorder %s52_s26, %s723_s25  ;;  %p729_p7 = scmp.lt.s32.totalorder %s723_s25, %s723_s25 }
  0x2e   :  { %p730_p8 = por %p729_p7, %p728_p6 }
  0x30   :  { %p731_p9 = pnand %p730_p8, %p724_p5 }
  0x32   :  { %734 = shalt.err (!%p731_p9)
}
  0x33   :  { %57 = dma.hbm_to_vmem [thread:$0]  %s968_s5, 1024, %s52_s26, [#allocation6], %s788_s19, %s788_s19, %s789_s20  }
  0x34   :  { %s792_s27 = smov [#allocation8]   ;;  %s735_s11 = scalar_lea.hbm %s970_s7, 1024 }
  0x35   :  { %s65_s28 = sshll.u32 %s792_s27, 4  ;;  %p736_p10 = scmp.ne.s32.totalorder %s970_s7, %s735_s11  ;;  %s66_s28 = int_to_ptr.vmem [resolvable:$true] %s65_s28 }
  0x36   :  { %p739_p11 = scmp.lt.u32.totalorder %s735_s11, %s970_s7 }
  0x38   :  { %p741_p12 = pnand %p739_p11, %p736_p10 }
  0x3a   :  { %744 = shalt.err (!%p741_p12)
}
  0x3b   :  { %s745_s14 = scalar_lea.vmem %s66_s28, 1024  ;;  %p750_p0 = scmp.lt.s32.totalorder %s66_s28, %s66_s28 }
  0x3c   :  { %p746_p13 = scmp.ne.s32.totalorder %s66_s28, %s745_s14  ;;  %p751_p1 = scmp.lt.s32.totalorder %s745_s14, %s745_s14 }
  0x3e   :  { %p752_p2 = por %p751_p1, %p750_p0 }
  0x40   :  { %p753_p3 = pnand %p752_p2, %p746_p13 }
  0x42   :  { %756 = shalt.err (!%p753_p3)
}
  0x43   :  { %71 = dma.hbm_to_vmem [thread:$0]  %s970_s7, 1024, %s66_s28, [#allocation9], %s788_s19, %s788_s19, %s789_s20  }
  0x44   :  { %779 = dma.done.wait [#allocation3], 128  }
  0x45   :  { %780 = vsyncadd [#allocation3], 4294967168 }
  0x46   :  { %781 = dma.done.wait [#allocation6], 2048  }
  0x47   :  { %782 = vsyncadd [#allocation6], 4294965248 }
  0x48   :  { %783 = dma.done.wait [#allocation9], 1024  }
  0x49   :  { %784 = vsyncadd [#allocation9], 4294966272  ;;  %v793_v0 = vmov 0.0   ;;  %vm794_vm0 = vmmov 0   ;;  %vm107_vm1 = vcmask 1044480   ;;  %v87_v2 = vld [vmem:[#allocation2] sm:$0xff] }
  0x4a   :  { %569 = vmatprep.subr.bf16.mxu0 %v793_v0  ;;  %571 = vmatprep.mubr.msk.bf16.mxu0 %vm794_vm0, %v793_v0  ;;  %v644_v1 = vld [vmem:[%s964_s1] sm:$0x1f]   ;;  %v88_v4 = vpack.c.bf16 %v87_v2, %v87_v2  ;;  %v645_v5 = vld [vmem:[#allocation5] sm:$0xff]   ;;  %vm103_vm2 = vcmask 80896   ;;  %v646_v6 = vld [vmem:[#allocation5 + $0x8] sm:$0xff]   ;;  %s795_s21 = smov [#allocation10]  }
  0x4b   :  { %575 = vmatprep.subr.bf16.mxu1 %v793_v0  ;;  %591 = vmatprep.mubr.msk.bf16.mxu1 %vm794_vm0, %v793_v0  ;;  %v109_v3 = vsel %vm107_vm1, %v644_v1, 0  ;;  %v647_v7 = vld [vmem:[#allocation5 + $0x10] sm:$0xff]   ;;  %v648_v8 = vld [vmem:[#allocation5 + $0x18] sm:$0xff]   ;;  %v649_v9 = vld [vmem:[#allocation5 + $0x20] sm:$0xff]   ;;  %s499_s22 = sshll.u32 %s795_s21, 4  ;;  %vm491_vm3 = vcmask 261120   ;;  %s500_s22 = int_to_ptr.vmem [resolvable:$true] %s499_s22 }
  0x4c   :  { %570 = vmatpush3.bf16.msra.mxu0 %v109_v3  ;;  %576 = vmatpush3.bf16.msra.mxu1 %v645_v5  ;;  %v650_v10 = vld [vmem:[#allocation5 + $0x28] sm:$0xff]   ;;  %v651_v11 = vld [vmem:[#allocation5 + $0x30] sm:$0xff]   ;;  %v652_v12 = vld [vmem:[#allocation5 + $0x38] sm:$0xff]   ;;  %p762_p5 = scmp.lt.s32.totalorder %s500_s22, %s500_s22 }
  0x4d   :  { %595 = vmatprep.subr.bf16.mxu0 %v793_v0  ;;  %577 = vmatprep.subr.bf16.mxu1 %v793_v0  ;;  %v653_v13 = vld [vmem:[#allocation7] sm:$0xff]   ;;  %v654_v14 = vld [vmem:[#allocation7 + $0x8] sm:$0xff]   ;;  %v655_v15 = vld [vmem:[#allocation7 + $0x10] sm:$0xff]  }
  0x4e   :  { %v656_v16 = vld [vmem:[#allocation7 + $0x18] sm:$0xff]   ;;  %v657_v17 = vld [vmem:[#allocation7 + $0x20] sm:$0xff]   ;;  %v658_v18 = vld [vmem:[#allocation7 + $0x28] sm:$0xff]  }
  0x4f   :  { %572 = vmatmul.mubr.msk.bf16.vlgmr.msra.gmra.mrb[0].mxu0 %vm103_vm2, %v88_v4  ;;  %v510_v19 = vld [vmem:[%s965_s2] ss:$0 sm:$0xff]  ;;  %v659_v27 = vld [vmem:[#allocation7 + $0x30] sm:$0xff]   ;;  %v661_v29 = vld [vmem:[#allocation8] sm:$0xff]  }
  0x50   :  { %611 = vmatprep.mubr.msk.bf16.mxu0 %vm794_vm0, %v793_v0  ;;  %578 = vmatpush3.bf16.msra.mxu1 %v646_v6  ;;  %v660_v28 = vld [vmem:[#allocation7 + $0x38] sm:$0xff]   ;;  %v662_v30 = vld [vmem:[#allocation8 + $0x8] sm:$0xff]   ;;  %v663_v31 = vld [vmem:[#allocation8 + $0x10] sm:$0xff]  }
  0x51   :  { %579 = vmatprep.subr.bf16.mxu1 %v793_v0  ;;  %596 = vmatpush3.bf16.msra.mxu0 %v653_v13  ;;  %v664_v32 = vld [vmem:[#allocation8 + $0x18] sm:$0xff]   ;;  %v665_v33 = vld [vmem:[#allocation8 + $0x20] sm:$0xff]   ;;  %v666_v34 = vld [vmem:[#allocation8 + $0x28] sm:$0xff]  }
  0x52   :  { %597 = vmatprep.subr.bf16.mxu0 %v793_v0  ;;  %v513_v35 = vld [vmem:[%s967_s4] ss:$0 sm:$0xff]  ;;  %v667_v43 = vld [vmem:[#allocation8 + $0x30] sm:$0xff]  }
  0x53   :  { %v668_v44 = vld [vmem:[#allocation8 + $0x38] sm:$0xff]  }
  0x54   :  { %580 = vmatpush3.bf16.msra.mxu1 %v647_v7  ;;  %v522_v45 = vld [vmem:[%s969_s6] ss:$0 sm:$0xff]  ;;  %s757_s6 = scalar_lea.vmem %s500_s22, 128 }
  0x55   :  { %581 = vmatprep.subr.bf16.mxu1 %v793_v0  ;;  %598 = vmatpush3.bf16.msra.mxu0 %v654_v14  ;;  %v531_v53 = vld [vmem:[%s971_s8] ss:$0 sm:$0xff]  ;;  %p758_p4 = scmp.ne.s32.totalorder %s500_s22, %s757_s6  ;;  %p763_p6 = scmp.lt.s32.totalorder %s757_s6, %s757_s6 }
  0x56   :  { %599 = vmatprep.subr.bf16.mxu0 %v793_v0 }
  0x57   :  { %p764_p7 = por %p763_p6, %p762_p5 }
  0x58   :  { %582 = vmatpush3.bf16.msra.mxu1 %v648_v8 }
  0x59   :  { %583 = vmatprep.subr.bf16.mxu1 %v793_v0  ;;  %600 = vmatpush3.bf16.msra.mxu0 %v655_v15  ;;  %p765_p8 = pnand %p764_p7, %p758_p4 }
  0x5a   :  { %601 = vmatprep.subr.bf16.mxu0 %v793_v0 }
  0x5c   :  { %584 = vmatpush3.bf16.msra.mxu1 %v649_v9 }
  0x5d   :  { %585 = vmatprep.subr.bf16.mxu1 %v793_v0  ;;  %602 = vmatpush3.bf16.msra.mxu0 %v656_v16 }
  0x5e   :  { %603 = vmatprep.subr.bf16.mxu0 %v793_v0 }
  0x60   :  { %586 = vmatpush3.bf16.msra.mxu1 %v650_v10 }
  0x61   :  { %587 = vmatprep.subr.bf16.mxu1 %v793_v0  ;;  %604 = vmatpush3.bf16.msra.mxu0 %v657_v17 }
  0x62   :  { %605 = vmatprep.subr.bf16.mxu0 %v793_v0 }
  0x64   :  { %588 = vmatpush3.bf16.msra.mxu1 %v651_v11 }
  0x65   :  { %589 = vmatprep.subr.bf16.mxu1 %v793_v0  ;;  %606 = vmatpush3.bf16.msra.mxu0 %v658_v18 }
  0x66   :  { %607 = vmatprep.subr.bf16.mxu0 %v793_v0 }
  0x68   :  { %590 = vmatpush3.bf16.msra.mxu1 %v652_v12 }
  0x69   :  { %615 = vmatprep.subr.bf16.mxu1 %v793_v0  ;;  %608 = vmatpush3.bf16.msra.mxu0 %v659_v27 }
  0x6a   :  { %609 = vmatprep.subr.bf16.mxu0 %v793_v0 }
  0x6d   :  { %610 = vmatpush3.bf16.msra.mxu0 %v660_v28 }
 0x122   :  { %v145_v20 = vpop.f32.mrb[0].mxu0 }
 0x123   :  { %v146_v21 = vadd.f32 %v510_v19, %v145_v20  ;;  %v573_v22 = vpop.f32.mrb[1].mxu0 }
 0x124   :  { %v148_v23 = vpop.f32.mrb[2].mxu0 }
 0x125   :  { %v151_v24 = vmax.f32 %v146_v21, 0.0  ;;  %v574_v25 = vpop.f32.mrb[3].mxu0 }
 0x127   :  { %v152_v26 = vpack.c.bf16 %v151_v24, %v151_v24 }
 0x129   :  { %592 = vmatmul.mubr.bf16.vlgmr.msra.gmra.mrb[0].mxu1 %v152_v26 }
 0x12a   :  { %631 = vmatprep.mubr.msk.bf16.mxu1 %vm794_vm0, %v793_v0  ;;  %616 = vmatpush3.bf16.msra.mxu1 %v661_v29 }
 0x12b   :  { %617 = vmatprep.subr.bf16.mxu1 %v793_v0 }
 0x12e   :  { %618 = vmatpush3.bf16.msra.mxu1 %v662_v30 }
 0x12f   :  { %619 = vmatprep.subr.bf16.mxu1 %v793_v0 }
 0x132   :  { %620 = vmatpush3.bf16.msra.mxu1 %v663_v31 }
 0x133   :  { %621 = vmatprep.subr.bf16.mxu1 %v793_v0 }
 0x136   :  { %622 = vmatpush3.bf16.msra.mxu1 %v664_v32 }
 0x137   :  { %623 = vmatprep.subr.bf16.mxu1 %v793_v0 }
 0x13a   :  { %624 = vmatpush3.bf16.msra.mxu1 %v665_v33 }
 0x13b   :  { %625 = vmatprep.subr.bf16.mxu1 %v793_v0 }
 0x13e   :  { %626 = vmatpush3.bf16.msra.mxu1 %v666_v34 }
 0x13f   :  { %627 = vmatprep.subr.bf16.mxu1 %v793_v0 }
 0x142   :  { %628 = vmatpush3.bf16.msra.mxu1 %v667_v43 }
 0x143   :  { %629 = vmatprep.subr.bf16.mxu1 %v793_v0 }
 0x146   :  { %630 = vmatpush3.bf16.msra.mxu1 %v668_v44 }
 0x1fc   :  { %v258_v36 = vpop.f32.mrb[0].mxu1 }
 0x1fd   :  { %v259_v37 = vadd.f32 %v513_v35, %v258_v36  ;;  %v593_v38 = vpop.f32.mrb[1].mxu1 }
 0x1fe   :  { %v261_v39 = vpop.f32.mrb[2].mxu1 }
 0x1ff   :  { %v264_v40 = vmax.f32 %v259_v37, 0.0  ;;  %v594_v41 = vpop.f32.mrb[3].mxu1 }
 0x201   :  { %v265_v42 = vpack.c.bf16 %v264_v40, %v264_v40 }
 0x203   :  { %612 = vmatmul.mubr.bf16.vlgmr.msra.gmra.mrb[4].mxu0 %v265_v42 }
 0x2d6   :  { %v371_v46 = vpop.f32.mrb[4].mxu0 }
 0x2d7   :  { %v372_v47 = vadd.f32 %v522_v45, %v371_v46  ;;  %v613_v48 = vpop.f32.mrb[5].mxu0 }
 0x2d8   :  { %v374_v49 = vpop.f32.mrb[6].mxu0 }
 0x2d9   :  { %v377_v50 = vmax.f32 %v372_v47, 0.0  ;;  %v614_v51 = vpop.f32.mrb[7].mxu0 }
 0x2db   :  { %v378_v52 = vpack.c.bf16 %v377_v50, %v377_v50 }
 0x2dd   :  { %632 = vmatmul.mubr.bf16.vlgmr.msra.gmra.mrb[4].mxu1 %v378_v52 }
 0x3b0   :  { %v484_v54 = vpop.f32.mrb[4].mxu1 }
 0x3b1   :  { %v485_v55 = vadd.f32 %v531_v53, %v484_v54  ;;  %v633_v56 = vpop.f32.mrb[5].mxu1 }
 0x3b2   :  { %v487_v57 = vpop.f32.mrb[6].mxu1 }
 0x3b3   :  { %v490_v58 = vmax.f32 %v485_v55, 0.0  ;;  %v634_v59 = vpop.f32.mrb[7].mxu1 }
 0x3b5   :  { %492 = vst.msk [vmem:[#allocation10] sm:$0xff] %vm491_vm3, %v490_v58 }
 0x3b6   :  { %768 = shalt.err (!%p765_p8)
}
 0x3b7   :  { %s769_s25 = scalar_lea.hbm %s972_s9, 128 }
 0x3b8   :  { %p770_p9 = scmp.ne.s32.totalorder %s972_s9, %s769_s25  ;;  %p773_p10 = scmp.lt.u32.totalorder %s769_s25, %s972_s9 }
 0x3ba   :  { %p775_p11 = pnand %p773_p10, %p770_p9 }
 0x3bc   :  { %778 = shalt.err (!%p775_p11)
}
 0x3bd   :  { %502 = dma.vmem_to_hbm [thread:$0]  %s500_s22, 128, %s972_s9, [#allocation4]  }
 0x3be   :  { %785 = dma.done.wait [#allocation4], 128  }
 0x3bf   :  { %786 = vsyncadd [#allocation4], 4294967168 }
 0x3c0   :  { %506 = vsyncpa [#allocation3], 1 }
 0x3c1   :  { %507 = vsyncpa [#allocation6], 1 }
 0x3c2   :  { %508 = vsyncpa [#allocation9], 1 }
 0x3c3   :  { %509 = vsyncpa [#allocation4], 1 }

</bundles_post_ra>
